<compile_context>
chip_gen: v6e
topology: v6e:2x2x1
jax: 0.10.0
libtpu: 0.0.40
codegen_flags: <defaults>
</compile_context>

<pallas_src>
import jax
import jax.numpy as jnp
from jax.experimental import pallas as pl
from jax.experimental.pallas import tpu as pltpu  # noqa: F401  (TPU backend assumed)

# ----- model hyperparameters (small, synthetic) -----
MAX_AUDIO_SAMPLES = 256
EMOTIONS = ["angry", "disgust", "fear", "happy", "sad", "surprise", "neutral"]  # 7
NUM_EMOTIONS = len(EMOTIONS)

KC_PAD = 128      # im2col K dim (3*27 = 81) zero-padded to a full lane tile
COUT_PAD = 128    # conv out-channels (16) zero-padded so intermediates stay lane-dense
LOGIT_PAD = 128   # logits N dim (7) zero-padded to a full lane tile


# ===================== fused Pallas kernel =====================

def fused_forward_kernel(
    audio_ref, patches_ref, pool_ref,
    a_w1_ref, a_b1_ref, a_w2_ref, a_b2_ref,
    c_w_ref, c_b_ref, v_w1_ref, v_b1_ref,
    f_w1a_ref, f_w1v_ref, f_b1_ref, f_w2_ref, f_b2_ref,
    out_ref,
):
    """Entire EmotionRecognitionModel forward in one kernel (all operands VMEM-resident)."""
    bf16 = jnp.bfloat16

    # ---- audio branch: Linear(256,512)+ReLU -> Linear(512,128)+ReLU ----
    a = jnp.dot(audio_ref[...].astype(bf16), a_w1_ref[...],
                preferred_element_type=jnp.float32)
    a = jnp.maximum(a + a_b1_ref[...], 0.0)                       # (B, 512) f32
    a = jnp.dot(a.astype(bf16), a_w2_ref[...],
                preferred_element_type=jnp.float32)
    a = jnp.maximum(a + a_b2_ref[...], 0.0)                       # (B, 128) f32

    # ---- video branch: Conv3d (im2col matmul) + ReLU + global avg pool (MXU) ----
    c = jnp.dot(patches_ref[...], c_w_ref[...],
                preferred_element_type=jnp.float32)               # (B*P, 128) padded Cout
    c = jnp.maximum(c + c_b_ref[...], 0.0)
    v = jnp.dot(pool_ref[...], c.astype(bf16),
                preferred_element_type=jnp.float32)               # (B, 128)  mean over P
    # Linear(16,128)+ReLU (weight rows 16..127 are zero -> padded channels contribute 0)
    v = jnp.dot(v.astype(bf16), v_w1_ref[...],
                preferred_element_type=jnp.float32)
    v = jnp.maximum(v + v_b1_ref[...], 0.0)                       # (B, 128) f32

    # ---- fusion: split-K Linear(256,128)+ReLU (no concatenate) -> Linear(128,7) ----
    f = (jnp.dot(a.astype(bf16), f_w1a_ref[...], preferred_element_type=jnp.float32)
         + jnp.dot(v.astype(bf16), f_w1v_ref[...], preferred_element_type=jnp.float32))
    f = jnp.maximum(f + f_b1_ref[...], 0.0)                       # (B, 128) f32
    y = jnp.dot(f.astype(bf16), f_w2_ref[...],
                preferred_element_type=jnp.float32) + f_b2_ref[...]  # (B, 128) padded N
    out_ref[...] = y.astype(out_ref.dtype)                           # full lane-dense store


# ===================== plain-JAX glue (im2col, pooling matrix) =====================

def build_patches(video):
    """video: (B, Cin, T, H, W) NCDHW -> (B*P, KC_PAD) bf16, row-major over (b, t, h, w).

    Column flat index = (dt*9 + dh*3 + dw)*Cin + c, matching the reordered conv weight.
    Built channels-last with windows concatenated on the LAST axis: no (Kc,P) transpose.
    """
    B, Cin, T, H, W = video.shape
    P = T * H * W
    Kc = Cin * 27
    x = jnp.moveaxis(video, 1, -1)                                 # (B, T, H, W, Cin)
    xpad = jnp.pad(x, ((0, 0), (1, 1), (1, 1), (1, 1), (0, 0)))
    windows = [
        xpad[:, dt:dt + T, dh:dh + H, dw:dw + W, :]
        for dt in range(3) for dh in range(3) for dw in range(3)
    ]
    patches = jnp.concatenate(windows, axis=-1)                    # (B, T, H, W, 27*Cin)
    patches = patches.reshape(B * P, Kc)
    patches = jnp.pad(patches, ((0, 0), (0, KC_PAD - Kc)))         # lane-align K to 128
    return patches.astype(jnp.bfloat16)


def build_pool_matrix(B, P):
    """(B, B*P) block-diagonal 1/P matrix: pool @ conv_out == per-batch mean over positions."""
    pool = jnp.repeat(jnp.eye(B, dtype=jnp.float32), P, axis=1) / jnp.float32(P)
    return pool.astype(jnp.bfloat16)


# ===================== parameters =====================

def _uniform(key, shape, fan_in):
    bound = 1.0 / jnp.sqrt(jnp.float32(fan_in))
    return jax.random.uniform(key, shape, jnp.float32, -bound, bound)


def init_params(key):
    """PyTorch-layout f32 master params (deterministic)."""
    ks = jax.random.split(key, 16)
    p = {}
    # audio_model: Linear(MAX_AUDIO_SAMPLES,512) -> Linear(512,128)
    p["a_w1"] = _uniform(ks[0], (MAX_AUDIO_SAMPLES, 512), MAX_AUDIO_SAMPLES)
    p["a_b1"] = _uniform(ks[1], (512,), MAX_AUDIO_SAMPLES)
    p["a_w2"] = _uniform(ks[2], (512, 128), 512)
    p["a_b2"] = _uniform(ks[3], (128,), 512)
    # video_model: Conv3d(3,16,k=3,p=1) -> Linear(16,128)
    conv_fan_in = 3 * 3 * 3 * 3
    p["v_wc"] = _uniform(ks[4], (16, 3, 3, 3, 3), conv_fan_in)   # (Cout, Cin, kT, kH, kW)
    p["v_bc"] = _uniform(ks[5], (16,), conv_fan_in)
    p["v_w1"] = _uniform(ks[6], (16, 128), 16)
    p["v_b1"] = _uniform(ks[7], (128,), 16)
    # fusion_model: Linear(256,128) -> Linear(128, NUM_EMOTIONS)
    p["f_w1"] = _uniform(ks[8], (256, 128), 256)
    p["f_b1"] = _uniform(ks[9], (128,), 256)
    p["f_w2"] = _uniform(ks[10], (128, NUM_EMOTIONS), 128)
    p["f_b2"] = _uniform(ks[11], (NUM_EMOTIONS,), 128)
    return p


def prepare_params(p):
    """Convert master params to the fused-kernel layout: bf16 matmul weights, f32 (1,N)
    biases, im2col-ordered + K/Cout-padded conv weight, split fusion W1, N-padded logits."""
    bf16 = jnp.bfloat16
    Cout, Cin = p["v_wc"].shape[0], p["v_wc"].shape[1]
    Kc = Cin * 27
    # (Cout, Cin, kT, kH, kW) -> (Cout, kT, kH, kW, Cin) -> (Kc, Cout); row idx matches patches.
    c_w = jnp.transpose(p["v_wc"], (0, 2, 3, 4, 1)).reshape(Cout, Kc).T
    c_w = jnp.pad(c_w, ((0, KC_PAD - Kc), (0, COUT_PAD - Cout)))       # (128, 128)
    c_b = jnp.pad(p["v_bc"], (0, COUT_PAD - Cout)).reshape(1, -1)      # (1, 128)
    v_w1 = jnp.pad(p["v_w1"], ((0, COUT_PAD - Cout), (0, 0)))          # (128, 128), zero rows
    return dict(
        a_w1=p["a_w1"].astype(bf16), a_b1=p["a_b1"].reshape(1, -1),
        a_w2=p["a_w2"].astype(bf16), a_b2=p["a_b2"].reshape(1, -1),
        c_w=c_w.astype(bf16), c_b=c_b,
        v_w1=v_w1.astype(bf16), v_b1=p["v_b1"].reshape(1, -1),
        f_w1a=p["f_w1"][:128, :].astype(bf16),      # audio half of the concat
        f_w1v=p["f_w1"][128:, :].astype(bf16),      # video half of the concat
        f_b1=p["f_b1"].reshape(1, -1),
        f_w2=jnp.pad(p["f_w2"], ((0, 0), (0, LOGIT_PAD - NUM_EMOTIONS))).astype(bf16),
        f_b2=jnp.pad(p["f_b2"], (0, LOGIT_PAD - NUM_EMOTIONS)).reshape(1, -1),
    )


# ===================== forward =====================

@jax.jit
def emotion_forward(kparams, audio, video):
    B, _, T, H, W = video.shape
    P = T * H * W
    patches = build_patches(video)          # (B*P, 128) bf16
    pool = build_pool_matrix(B, P)          # (B, B*P)  bf16

    padded_logits = pl.pallas_call(
        fused_forward_kernel,
        out_shape=jax.ShapeDtypeStruct((B, LOGIT_PAD), jnp.float32),
        # No grid: every operand is a single full-array VMEM block (total < 1 MiB, fits
        # comfortably within v5e/v6e/v7x scoped VMEM limits).
    )(
        audio, patches, pool,
        kparams["a_w1"], kparams["a_b1"], kparams["a_w2"], kparams["a_b2"],
        kparams["c_w"], kparams["c_b"], kparams["v_w1"], kparams["v_b1"],
        kparams["f_w1a"], kparams["f_w1v"], kparams["f_b1"],
        kparams["f_w2"], kparams["f_b2"],
    )
    return padded_logits[:, :NUM_EMOTIONS]  # cheap (B,128)->(B,7) slice outside the kernel


if __name__ == "__main__":
    key = jax.random.PRNGKey(0)
    k_param, k_audio, k_video = jax.random.split(key, 3)

    params = init_params(k_param)
    kparams = prepare_params(params)

    B, T, H, W = 2, 4, 8, 8
    audio = jax.random.normal(k_audio, (B, MAX_AUDIO_SAMPLES), jnp.float32)
    video = jax.random.normal(k_video, (B, 3, T, H, W), jnp.float32)

    out = emotion_forward(kparams, audio, video)
    jax.block_until_ready(out)
    assert out.shape == (B, NUM_EMOTIONS), out.shape
    assert bool(jnp.isfinite(out).all()), "non-finite logits"
    print("KERNEL_OK")
</pallas_src>

<mosaic_0001>
module attributes {stable_mosaic.version = 11 : i64} {
  func.func @fused_forward_kernel(%arg0: memref<2x256xf32, #tpu.memory_space<vmem>>, %arg1: memref<512x128xbf16, #tpu.memory_space<vmem>>, %arg2: memref<2x512xbf16, #tpu.memory_space<vmem>>, %arg3: memref<256x512xbf16, #tpu.memory_space<vmem>>, %arg4: memref<1x512xf32, #tpu.memory_space<vmem>>, %arg5: memref<512x128xbf16, #tpu.memory_space<vmem>>, %arg6: memref<1x128xf32, #tpu.memory_space<vmem>>, %arg7: memref<128x128xbf16, #tpu.memory_space<vmem>>, %arg8: memref<1x128xf32, #tpu.memory_space<vmem>>, %arg9: memref<128x128xbf16, #tpu.memory_space<vmem>>, %arg10: memref<1x128xf32, #tpu.memory_space<vmem>>, %arg11: memref<128x128xbf16, #tpu.memory_space<vmem>>, %arg12: memref<128x128xbf16, #tpu.memory_space<vmem>>, %arg13: memref<1x128xf32, #tpu.memory_space<vmem>>, %arg14: memref<128x128xbf16, #tpu.memory_space<vmem>>, %arg15: memref<1x128xf32, #tpu.memory_space<vmem>>, %arg16: memref<2x128xf32, #tpu.memory_space<vmem>>) attributes {dimension_semantics = [], scalar_prefetch = 0 : i64, scratch_operands = 0 : i64, tpu.core_type = #tpu.core_type<tc>} {
    %c0 = arith.constant 0 : index
    %c0_0 = arith.constant 0 : index
    %0 = vector.load %arg0[%c0, %c0_0] : memref<2x256xf32, #tpu.memory_space<vmem>>, vector<2x256xf32>
    %1 = arith.truncf %0 : vector<2x256xf32> to vector<2x256xbf16>
    %c0_1 = arith.constant 0 : index
    %c0_2 = arith.constant 0 : index
    %2 = vector.load %arg3[%c0_1, %c0_2] : memref<256x512xbf16, #tpu.memory_space<vmem>>, vector<256x512xbf16>
    %cst = arith.constant dense<0.000000e+00> : vector<2x512xf32>
    %3 = tpu.matmul %1, %2, %cst {dimension_numbers = #tpu.dot_dimension_numbers<[1], [0], [0], [1], [0, 0, 1, 1], [], []>} : vector<2x256xbf16>, vector<256x512xbf16>, vector<2x512xf32> -> vector<2x512xf32>
    %c0_3 = arith.constant 0 : index
    %c0_4 = arith.constant 0 : index
    %4 = vector.load %arg4[%c0_3, %c0_4] : memref<1x512xf32, #tpu.memory_space<vmem>>, vector<1x512xf32>
    %5 = vector.broadcast %4 : vector<1x512xf32> to vector<2x512xf32>
    %6 = arith.addf %3, %5 : vector<2x512xf32>
    %cst_5 = arith.constant 0.000000e+00 : f32
    %7 = vector.broadcast %cst_5 : f32 to vector<2x512xf32>
    %8 = arith.maximumf %6, %7 : vector<2x512xf32>
    %9 = arith.truncf %8 : vector<2x512xf32> to vector<2x512xbf16>
    %c0_6 = arith.constant 0 : index
    %c0_7 = arith.constant 0 : index
    %10 = vector.load %arg5[%c0_6, %c0_7] : memref<512x128xbf16, #tpu.memory_space<vmem>>, vector<512x128xbf16>
    %cst_8 = arith.constant dense<0.000000e+00> : vector<2x128xf32>
    %11 = tpu.matmul %9, %10, %cst_8 {dimension_numbers = #tpu.dot_dimension_numbers<[1], [0], [0], [1], [0, 0, 1, 1], [], []>} : vector<2x512xbf16>, vector<512x128xbf16>, vector<2x128xf32> -> vector<2x128xf32>
    %c0_9 = arith.constant 0 : index
    %c0_10 = arith.constant 0 : index
    %12 = vector.load %arg6[%c0_9, %c0_10] : memref<1x128xf32, #tpu.memory_space<vmem>>, vector<1x128xf32>
    %13 = vector.broadcast %12 : vector<1x128xf32> to vector<2x128xf32>
    %14 = arith.addf %11, %13 : vector<2x128xf32>
    %cst_11 = arith.constant 0.000000e+00 : f32
    %15 = vector.broadcast %cst_11 : f32 to vector<2x128xf32>
    %16 = arith.maximumf %14, %15 : vector<2x128xf32>
    %c0_12 = arith.constant 0 : index
    %c0_13 = arith.constant 0 : index
    %17 = vector.load %arg1[%c0_12, %c0_13] : memref<512x128xbf16, #tpu.memory_space<vmem>>, vector<512x128xbf16>
    %c0_14 = arith.constant 0 : index
    %c0_15 = arith.constant 0 : index
    %18 = vector.load %arg7[%c0_14, %c0_15] : memref<128x128xbf16, #tpu.memory_space<vmem>>, vector<128x128xbf16>
    %cst_16 = arith.constant dense<0.000000e+00> : vector<512x128xf32>
    %19 = tpu.matmul %17, %18, %cst_16 {dimension_numbers = #tpu.dot_dimension_numbers<[1], [0], [0], [1], [0, 0, 1, 1], [], []>} : vector<512x128xbf16>, vector<128x128xbf16>, vector<512x128xf32> -> vector<512x128xf32>
    %c0_17 = arith.constant 0 : index
    %c0_18 = arith.constant 0 : index
    %20 = vector.load %arg8[%c0_17, %c0_18] : memref<1x128xf32, #tpu.memory_space<vmem>>, vector<1x128xf32>
    %21 = vector.broadcast %20 : vector<1x128xf32> to vector<512x128xf32>
    %22 = arith.addf %19, %21 : vector<512x128xf32>
    %cst_19 = arith.constant 0.000000e+00 : f32
    %23 = vector.broadcast %cst_19 : f32 to vector<512x128xf32>
    %24 = arith.maximumf %22, %23 : vector<512x128xf32>
    %c0_20 = arith.constant 0 : index
    %c0_21 = arith.constant 0 : index
    %25 = vector.load %arg2[%c0_20, %c0_21] : memref<2x512xbf16, #tpu.memory_space<vmem>>, vector<2x512xbf16>
    %26 = arith.truncf %24 : vector<512x128xf32> to vector<512x128xbf16>
    %cst_22 = arith.constant dense<0.000000e+00> : vector<2x128xf32>
    %27 = tpu.matmul %25, %26, %cst_22 {dimension_numbers = #tpu.dot_dimension_numbers<[1], [0], [0], [1], [0, 0, 1, 1], [], []>} : vector<2x512xbf16>, vector<512x128xbf16>, vector<2x128xf32> -> vector<2x128xf32>
    %28 = arith.truncf %27 : vector<2x128xf32> to vector<2x128xbf16>
    %c0_23 = arith.constant 0 : index
    %c0_24 = arith.constant 0 : index
    %29 = vector.load %arg9[%c0_23, %c0_24] : memref<128x128xbf16, #tpu.memory_space<vmem>>, vector<128x128xbf16>
    %cst_25 = arith.constant dense<0.000000e+00> : vector<2x128xf32>
    %30 = tpu.matmul %28, %29, %cst_25 {dimension_numbers = #tpu.dot_dimension_numbers<[1], [0], [0], [1], [0, 0, 1, 1], [], []>} : vector<2x128xbf16>, vector<128x128xbf16>, vector<2x128xf32> -> vector<2x128xf32>
    %c0_26 = arith.constant 0 : index
    %c0_27 = arith.constant 0 : index
    %31 = vector.load %arg10[%c0_26, %c0_27] : memref<1x128xf32, #tpu.memory_space<vmem>>, vector<1x128xf32>
    %32 = vector.broadcast %31 : vector<1x128xf32> to vector<2x128xf32>
    %33 = arith.addf %30, %32 : vector<2x128xf32>
    %cst_28 = arith.constant 0.000000e+00 : f32
    %34 = vector.broadcast %cst_28 : f32 to vector<2x128xf32>
    %35 = arith.maximumf %33, %34 : vector<2x128xf32>
    %36 = arith.truncf %16 : vector<2x128xf32> to vector<2x128xbf16>
    %c0_29 = arith.constant 0 : index
    %c0_30 = arith.constant 0 : index
    %37 = vector.load %arg11[%c0_29, %c0_30] : memref<128x128xbf16, #tpu.memory_space<vmem>>, vector<128x128xbf16>
    %cst_31 = arith.constant dense<0.000000e+00> : vector<2x128xf32>
    %38 = tpu.matmul %36, %37, %cst_31 {dimension_numbers = #tpu.dot_dimension_numbers<[1], [0], [0], [1], [0, 0, 1, 1], [], []>} : vector<2x128xbf16>, vector<128x128xbf16>, vector<2x128xf32> -> vector<2x128xf32>
    %39 = arith.truncf %35 : vector<2x128xf32> to vector<2x128xbf16>
    %c0_32 = arith.constant 0 : index
    %c0_33 = arith.constant 0 : index
    %40 = vector.load %arg12[%c0_32, %c0_33] : memref<128x128xbf16, #tpu.memory_space<vmem>>, vector<128x128xbf16>
    %cst_34 = arith.constant dense<0.000000e+00> : vector<2x128xf32>
    %41 = tpu.matmul %39, %40, %cst_34 {dimension_numbers = #tpu.dot_dimension_numbers<[1], [0], [0], [1], [0, 0, 1, 1], [], []>} : vector<2x128xbf16>, vector<128x128xbf16>, vector<2x128xf32> -> vector<2x128xf32>
    %42 = arith.addf %38, %41 : vector<2x128xf32>
    %c0_35 = arith.constant 0 : index
    %c0_36 = arith.constant 0 : index
    %43 = vector.load %arg13[%c0_35, %c0_36] : memref<1x128xf32, #tpu.memory_space<vmem>>, vector<1x128xf32>
    %44 = vector.broadcast %43 : vector<1x128xf32> to vector<2x128xf32>
    %45 = arith.addf %42, %44 : vector<2x128xf32>
    %cst_37 = arith.constant 0.000000e+00 : f32
    %46 = vector.broadcast %cst_37 : f32 to vector<2x128xf32>
    %47 = arith.maximumf %45, %46 : vector<2x128xf32>
    %48 = arith.truncf %47 : vector<2x128xf32> to vector<2x128xbf16>
    %c0_38 = arith.constant 0 : index
    %c0_39 = arith.constant 0 : index
    %49 = vector.load %arg14[%c0_38, %c0_39] : memref<128x128xbf16, #tpu.memory_space<vmem>>, vector<128x128xbf16>
    %cst_40 = arith.constant dense<0.000000e+00> : vector<2x128xf32>
    %50 = tpu.matmul %48, %49, %cst_40 {dimension_numbers = #tpu.dot_dimension_numbers<[1], [0], [0], [1], [0, 0, 1, 1], [], []>} : vector<2x128xbf16>, vector<128x128xbf16>, vector<2x128xf32> -> vector<2x128xf32>
    %c0_41 = arith.constant 0 : index
    %c0_42 = arith.constant 0 : index
    %51 = vector.load %arg15[%c0_41, %c0_42] : memref<1x128xf32, #tpu.memory_space<vmem>>, vector<1x128xf32>
    %52 = vector.broadcast %51 : vector<1x128xf32> to vector<2x128xf32>
    %53 = arith.addf %50, %52 : vector<2x128xf32>
    %c0_43 = arith.constant 0 : index
    %c0_44 = arith.constant 0 : index
    %54 = vector.load %arg16[%c0_43, %c0_44] : memref<2x128xf32, #tpu.memory_space<vmem>>, vector<2x128xf32>
    tpu.vector_store %arg16[%c0_43, %c0_44], %53 {strides = array<i32>} : memref<2x128xf32, #tpu.memory_space<vmem>>, vector<2x128xf32>,
    return
  }
}

</mosaic_0001>

<bundles_post_ra>
// kernel: emotion_forward.1
= control target key start
LH: loop header
LB: loop body
LE: loop exit
PB: predicated region body
PF: predicated region fallthrough
CT: control target
= control target key end

     0   :  { %s3727_s0 = inlined_call_operand.vmem [shape: f32[2,256], index: 0, kind: input, shape index: {}]   ;;  %s3728_s1 = inlined_call_operand.vmem [shape: bf16[512,128], index: 1, kind: input, shape index: {}]   ;;  %s3729_s2 = inlined_call_operand.vmem [shape: bf16[2,512], index: 2, kind: input, shape index: {}]   ;;  %s3730_s3 = inlined_call_operand.vmem [shape: bf16[256,512], index: 3, kind: input, shape index: {}]   ;;  %s3731_s4 = inlined_call_operand.vmem [shape: f32[1,512], index: 4, kind: input, shape index: {}]   ;;  %s3732_s5 = inlined_call_operand.vmem [shape: bf16[512,128], index: 5, kind: input, shape index: {}]   ;;  %s3733_s6 = inlined_call_operand.vmem [shape: f32[1,128], index: 6, kind: input, shape index: {}]   ;;  %s3734_s7 = inlined_call_operand.vmem [shape: bf16[128,128], index: 7, kind: input, shape index: {}]   ;;  %s3735_s8 = inlined_call_operand.vmem [shape: f32[1,128], index: 8, kind: input, shape index: {}]   ;;  %s3736_s9 = inlined_call_operand.vmem [shape: bf16[128,128], index: 9, kind: input, shape index: {}]   ;;  %s3737_s10 = inlined_call_operand.vmem [shape: f32[1,128], index: 10, kind: input, shape index: {}]   ;;  %s3738_s11 = inlined_call_operand.vmem [shape: bf16[128,128], index: 11, kind: input, shape index: {}]   ;;  %s3739_s12 = inlined_call_operand.vmem [shape: bf16[128,128], index: 12, kind: input, shape index: {}]   ;;  %s3740_s13 = inlined_call_operand.vmem [shape: f32[1,128], index: 13, kind: input, shape index: {}]   ;;  %s3741_s14 = inlined_call_operand.vmem [shape: bf16[128,128], index: 14, kind: input, shape index: {}]   ;;  %s3742_s15 = inlined_call_operand.vmem [shape: f32[1,128], index: 15, kind: input, shape index: {}]   ;;  %s3743_s16 = inlined_call_operand.hbm [shape: f32[2,128], index: 16, kind: output, shape index: {}]  }
   0x1   :  { %3744 = sst [smem:[#allocation5_spill]] %s3727_s0 }
   0x2   :  { %v2693_v0 = vld [vmem:[%s3730_s3 + $0xe4] ss:$16 sps:$4 sm:$0xff]   ;;  %v2695_v1 = vld [vmem:[%s3730_s3 + $0xe0] ss:$16 sps:$4 sm:$0xff]   ;;  %v2696_v2 = vld [vmem:[%s3730_s3 + $0xec] ss:$16 sps:$4 sm:$0xff]  }
   0x3   :  { %475 = vmatprep.subr.bf16.mxu0 %v2693_v0  ;;  %v2698_v3 = vld [vmem:[%s3730_s3 + $0xe8] ss:$16 sps:$4 sm:$0xff]   ;;  %v2699_v4 = vld [vmem:[%s3730_s3 + $0xc4] ss:$16 sps:$4 sm:$0xff]   ;;  %v2701_v5 = vld [vmem:[%s3730_s3 + $0xc0] ss:$16 sps:$4 sm:$0xff]   ;;  %516 = vmatprep.subr.bf16.mxu1 %v2696_v2 }
   0x4   :  { %476 = vmatpush1.bf16.msra.mxu0 %v2695_v1  ;;  %v2702_v6 = vld [vmem:[%s3730_s3 + $0xcc] ss:$16 sps:$4 sm:$0xff]   ;;  %517 = vmatpush1.bf16.msra.mxu1 %v2698_v3  ;;  %v2704_v7 = vld [vmem:[%s3730_s3 + $0xc8] ss:$16 sps:$4 sm:$0xff]   ;;  %v2705_v8 = vld [vmem:[%s3730_s3 + $0xa4] ss:$16 sps:$4 sm:$0xff]  }
   0x5   :  { %477 = vmatprep.subr.bf16.mxu0 %v2699_v4  ;;  %518 = vmatprep.subr.bf16.mxu1 %v2702_v6  ;;  %v2707_v9 = vld [vmem:[%s3730_s3 + $0xa0] ss:$16 sps:$4 sm:$0xff]   ;;  %v2708_v10 = vld [vmem:[%s3730_s3 + $0xac] ss:$16 sps:$4 sm:$0xff]   ;;  %v2711_v11 = vld [vmem:[%s3730_s3 + $0x84] ss:$16 sps:$4 sm:$0xff]  }
   0x6   :  { %v2710_v12 = vld [vmem:[%s3730_s3 + $0xa8] ss:$16 sps:$4 sm:$0xff]   ;;  %v2714_v13 = vld [vmem:[%s3730_s3 + $0x8c] ss:$16 sps:$4 sm:$0xff]   ;;  %v2713_v14 = vld [vmem:[%s3730_s3 + $0x80] ss:$16 sps:$4 sm:$0xff]  }
   0x7   :  { %v2717_v15 = vld [vmem:[%s3730_s3 + $0x64] ss:$16 sps:$4 sm:$0xff]   ;;  %v2716_v16 = vld [vmem:[%s3730_s3 + $0x88] ss:$16 sps:$4 sm:$0xff]   ;;  %v2720_v17 = vld [vmem:[%s3730_s3 + $0x6c] ss:$16 sps:$4 sm:$0xff]  }
   0x8   :  { %478 = vmatpush1.bf16.msra.mxu0 %v2701_v5  ;;  %519 = vmatpush1.bf16.msra.mxu1 %v2704_v7  ;;  %v2719_v18 = vld [vmem:[%s3730_s3 + $0x60] ss:$16 sps:$4 sm:$0xff]   ;;  %v2723_v19 = vld [vmem:[%s3730_s3 + $0x44] ss:$16 sps:$4 sm:$0xff]   ;;  %v2722_v20 = vld [vmem:[%s3730_s3 + $0x68] ss:$16 sps:$4 sm:$0xff]  }
   0x9   :  { %479 = vmatprep.subr.bf16.mxu0 %v2705_v8  ;;  %520 = vmatprep.subr.bf16.mxu1 %v2708_v10  ;;  %v2726_v21 = vld [vmem:[%s3730_s3 + $0x4c] ss:$16 sps:$4 sm:$0xff]   ;;  %v2725_v22 = vld [vmem:[%s3730_s3 + $0x40] ss:$16 sps:$4 sm:$0xff]   ;;  %v2729_v23 = vld [vmem:[%s3730_s3 + $0x24] ss:$16 sps:$4 sm:$0xff]  }
   0xa   :  { %v2728_v24 = vld [vmem:[%s3730_s3 + $0x48] ss:$16 sps:$4 sm:$0xff]   ;;  %v2732_v25 = vld [vmem:[%s3730_s3 + $0x2c] ss:$16 sps:$4 sm:$0xff]   ;;  %v2731_v26 = vld [vmem:[%s3730_s3 + $0x20] ss:$16 sps:$4 sm:$0xff]  }
   0xb   :  { %v2735_v27 = vld [vmem:[%s3730_s3 + $0x4] ss:$16 sps:$4 sm:$0xff]   ;;  %v2734_v28 = vld [vmem:[%s3730_s3 + $0x28] ss:$16 sps:$4 sm:$0xff]   ;;  %v2738_v29 = vld [vmem:[%s3730_s3 + $0xc] ss:$16 sps:$4 sm:$0xff]  }
   0xc   :  { %480 = vmatpush1.bf16.msra.mxu0 %v2707_v9  ;;  %521 = vmatpush1.bf16.msra.mxu1 %v2710_v12  ;;  %v2737_v30 = vld [vmem:[%s3730_s3] ss:$16 sps:$4 sm:$0xff]   ;;  %v2741_v31 = vld [vmem:[%s3730_s3 + $0x1e4] ss:$16 sps:$4 sm:$0xff]   ;;  %v2740_v32 = vld [vmem:[%s3730_s3 + $0x8] ss:$16 sps:$4 sm:$0xff]  }
   0xd   :  { %481 = vmatprep.subr.bf16.mxu0 %v2711_v11  ;;  %522 = vmatprep.subr.bf16.mxu1 %v2714_v13  ;;  %v2744_v33 = vld [vmem:[%s3730_s3 + $0x1ec] ss:$16 sps:$4 sm:$0xff]   ;;  %v2743_v34 = vld [vmem:[%s3730_s3 + $0x1e0] ss:$16 sps:$4 sm:$0xff]   ;;  %v2747_v35 = vld [vmem:[%s3730_s3 + $0x1c4] ss:$16 sps:$4 sm:$0xff]  }
   0xe   :  { %v2746_v36 = vld [vmem:[%s3730_s3 + $0x1e8] ss:$16 sps:$4 sm:$0xff]   ;;  %v2750_v37 = vld [vmem:[%s3730_s3 + $0x1cc] ss:$16 sps:$4 sm:$0xff]   ;;  %v2749_v38 = vld [vmem:[%s3730_s3 + $0x1c0] ss:$16 sps:$4 sm:$0xff]  }
   0xf   :  { %v2753_v39 = vld [vmem:[%s3730_s3 + $0x1a4] ss:$16 sps:$4 sm:$0xff]   ;;  %v2752_v40 = vld [vmem:[%s3730_s3 + $0x1c8] ss:$16 sps:$4 sm:$0xff]   ;;  %v2756_v41 = vld [vmem:[%s3730_s3 + $0x1ac] ss:$16 sps:$4 sm:$0xff]  }
  0x10   :  { %482 = vmatpush1.bf16.msra.mxu0 %v2713_v14  ;;  %523 = vmatpush1.bf16.msra.mxu1 %v2716_v16  ;;  %v2755_v42 = vld [vmem:[%s3730_s3 + $0x1a0] ss:$16 sps:$4 sm:$0xff]   ;;  %v2758_v43 = vld [vmem:[%s3730_s3 + $0x1a8] ss:$16 sps:$4 sm:$0xff]   ;;  %v2759_v44 = vld [vmem:[%s3730_s3 + $0x184] ss:$16 sps:$4 sm:$0xff]  }
  0x11   :  { %483 = vmatprep.subr.bf16.mxu0 %v2717_v15  ;;  %524 = vmatprep.subr.bf16.mxu1 %v2720_v17  ;;  %v2761_v45 = vld [vmem:[%s3730_s3 + $0x180] ss:$16 sps:$4 sm:$0xff]   ;;  %v2762_v46 = vld [vmem:[%s3730_s3 + $0x18c] ss:$16 sps:$4 sm:$0xff]   ;;  %s3745_s27 = sld [smem:[#allocation5_spill]] }
  0x12   :  { %v2764_v48 = vld [vmem:[%s3730_s3 + $0x188] ss:$16 sps:$4 sm:$0xff]   ;;  %v2765_v50 = vld [vmem:[%s3730_s3 + $0x164] ss:$16 sps:$4 sm:$0xff]   ;;  %v2767_v51 = vld [vmem:[%s3730_s3 + $0x160] ss:$16 sps:$4 sm:$0xff]  }
  0x13   :  { %v2768_v53 = vld [vmem:[%s3730_s3 + $0x16c] ss:$16 sps:$4 sm:$0xff]   ;;  %v2770_v54 = vld [vmem:[%s3730_s3 + $0x168] ss:$16 sps:$4 sm:$0xff]   ;;  %v2771_v55 = vld [vmem:[%s3730_s3 + $0x144] ss:$16 sps:$4 sm:$0xff]  }
  0x14   :  { %484 = vmatpush1.bf16.msra.mxu0 %v2719_v18  ;;  %525 = vmatpush1.bf16.msra.mxu1 %v2722_v20  ;;  %v2773_v56 = vld [vmem:[%s3730_s3 + $0x140] ss:$16 sps:$4 sm:$0xff]   ;;  %v2774_v57 = vld [vmem:[%s3730_s3 + $0x14c] ss:$16 sps:$4 sm:$0xff]   ;;  %v2776_v58 = vld [vmem:[%s3730_s3 + $0x148] ss:$16 sps:$4 sm:$0xff]  }
  0x15   :  { %485 = vmatprep.subr.bf16.mxu0 %v2723_v19  ;;  %526 = vmatprep.subr.bf16.mxu1 %v2726_v21  ;;  %v2777_v59 = vld [vmem:[%s3730_s3 + $0x124] ss:$16 sps:$4 sm:$0xff]   ;;  %v2779_v60 = vld [vmem:[%s3730_s3 + $0x120] ss:$16 sps:$4 sm:$0xff]   ;;  %v2780_v61 = vld [vmem:[%s3730_s3 + $0x12c] ss:$16 sps:$4 sm:$0xff]  }
  0x16   :  { %v2782_v62 = vld [vmem:[%s3730_s3 + $0x128] ss:$16 sps:$4 sm:$0xff]   ;;  %v2783_v63 = vld [vmem:[%s3730_s3 + $0x104] ss:$16 sps:$4 sm:$0xff]   ;;  %v2785_v0 = vld [vmem:[%s3730_s3 + $0x100] ss:$16 sps:$4 sm:$0xff]  }
  0x17   :  { %v2190_v47 = vld.sshfl [vmem:[%s3745_s27] sm:$0x33 pattern:$0x76325410]  ;;  %v2786_v1 = vld [vmem:[%s3730_s3 + $0x10c] ss:$16 sps:$4 sm:$0xff]  }
  0x18   :  { %486 = vmatpush1.bf16.msra.mxu0 %v2725_v22  ;;  %527 = vmatpush1.bf16.msra.mxu1 %v2728_v24  ;;  %v64_v49 = vcombine.high %v2190_v47, %v2190_v47  ;;  %v2788_v2 = vld [vmem:[%s3730_s3 + $0x108] ss:$16 sps:$4 sm:$0xff]   ;;  %v67_v5 = vpack.c.bf16 %v2190_v47, %v2190_v47  ;;  %v2792_v7 = vld [vmem:[%s3732_s5 + $0x70] sm:$0xff]   ;;  %v2800_v15 = vld [vmem:[%s3732_s5 + $0x60] sm:$0xff]  }
  0x19   :  { %487 = vmatprep.subr.bf16.mxu0 %v2729_v23  ;;  %528 = vmatprep.subr.bf16.mxu1 %v2732_v25  ;;  %v2789_v3 = vld [vmem:[%s3732_s5 + $0x78] sm:$0xff]   ;;  %v2794_v9 = vld [vmem:[%s3732_s5 + $0x30] sm:$0xff]   ;;  %v2796_v11 = vld [vmem:[%s3732_s5 + $0x68] sm:$0xff]  }
  0x1a   :  { %v68_v52 = vpack.c.bf16 %v64_v49, %v64_v49  ;;  %v2790_v4 = vld [vmem:[%s3732_s5 + $0x38] sm:$0xff]   ;;  %v2795_v10 = vld [vmem:[%s3732_s5 + $0xf0] sm:$0xff]   ;;  %v2799_v13 = vld [vmem:[%s3732_s5 + $0xe8] sm:$0xff]  }
  0x1b   :  { %v2791_v6 = vld [vmem:[%s3732_s5 + $0xf8] sm:$0xff]   ;;  %v2797_v12 = vld [vmem:[%s3732_s5 + $0xb0] sm:$0xff]   ;;  %v2798_v14 = vld [vmem:[%s3732_s5 + $0x28] sm:$0xff]  }
  0x1c   :  { %488 = vmatpush1.bf16.msra.mxu0 %v2731_v26  ;;  %529 = vmatpush1.bf16.msra.mxu1 %v2734_v28  ;;  %v2793_v8 = vld [vmem:[%s3732_s5 + $0xb8] sm:$0xff]   ;;  %v2801_v16 = vld [vmem:[%s3732_s5 + $0xa8] sm:$0xff]   ;;  %v2803_v17 = vld [vmem:[%s3732_s5 + $0xe0] sm:$0xff]  }
  0x1d   :  { %489 = vmatprep.subr.bf16.mxu0 %v2735_v27  ;;  %530 = vmatprep.subr.bf16.mxu1 %v2738_v29  ;;  %v2802_v18 = vld [vmem:[%s3732_s5 + $0x20] sm:$0xff]   ;;  %v2804_v19 = vld [vmem:[%s3732_s5 + $0x58] sm:$0xff]   ;;  %v2808_v23 = vld [vmem:[%s3732_s5 + $0x50] sm:$0xff]  }
  0x1e   :  { %507 = vmatprep.mubr.bf16.mxu0 %v68_v52  ;;  %548 = vmatprep.mubr.bf16.mxu1 %v68_v52  ;;  %v2805_v20 = vld [vmem:[%s3732_s5 + $0xa0] sm:$0xff]   ;;  %v2807_v21 = vld [vmem:[%s3732_s5 + $0xd8] sm:$0xff]   ;;  %v2810_v25 = vld [vmem:[%s3732_s5 + $0x10] sm:$0xff]  }
  0x1f   :  { %v2806_v22 = vld [vmem:[%s3732_s5 + $0x18] sm:$0xff]  }
  0x20   :  { %490 = vmatpush1.bf16.msra.mxu0 %v2737_v30  ;;  %531 = vmatpush1.bf16.msra.mxu1 %v2740_v32  ;;  %v2809_v24 = vld [vmem:[%s3732_s5 + $0x98] sm:$0xff]  }
  0x21   :  { %491 = vmatprep.subr.bf16.mxu0 %v2741_v31  ;;  %532 = vmatprep.subr.bf16.mxu1 %v2744_v33 }
  0x24   :  { %492 = vmatpush2.bf16.msra.mxu0 %v2743_v34  ;;  %533 = vmatpush2.bf16.msra.mxu1 %v2746_v36 }
  0x25   :  { %493 = vmatprep.subr.bf16.mxu0 %v2747_v35  ;;  %534 = vmatprep.subr.bf16.mxu1 %v2750_v37 }
  0x28   :  { %494 = vmatpush2.bf16.msra.mxu0 %v2749_v38  ;;  %535 = vmatpush2.bf16.msra.mxu1 %v2752_v40 }
  0x29   :  { %495 = vmatprep.subr.bf16.mxu0 %v2753_v39  ;;  %536 = vmatprep.subr.bf16.mxu1 %v2756_v41 }
  0x2c   :  { %496 = vmatpush2.bf16.msra.mxu0 %v2755_v42  ;;  %537 = vmatpush2.bf16.msra.mxu1 %v2758_v43 }
  0x2d   :  { %497 = vmatprep.subr.bf16.mxu0 %v2759_v44  ;;  %538 = vmatprep.subr.bf16.mxu1 %v2762_v46 }
  0x30   :  { %498 = vmatpush2.bf16.msra.mxu0 %v2761_v45  ;;  %539 = vmatpush2.bf16.msra.mxu1 %v2764_v48 }
  0x31   :  { %499 = vmatprep.subr.bf16.mxu0 %v2765_v50  ;;  %540 = vmatprep.subr.bf16.mxu1 %v2768_v53 }
  0x34   :  { %500 = vmatpush2.bf16.msra.mxu0 %v2767_v51  ;;  %541 = vmatpush2.bf16.msra.mxu1 %v2770_v54 }
  0x35   :  { %501 = vmatprep.subr.bf16.mxu0 %v2771_v55  ;;  %542 = vmatprep.subr.bf16.mxu1 %v2774_v57 }
  0x38   :  { %502 = vmatpush2.bf16.msra.mxu0 %v2773_v56  ;;  %543 = vmatpush2.bf16.msra.mxu1 %v2776_v58 }
  0x39   :  { %503 = vmatprep.subr.bf16.mxu0 %v2777_v59  ;;  %544 = vmatprep.subr.bf16.mxu1 %v2780_v61 }
  0x3c   :  { %504 = vmatpush2.bf16.msra.mxu0 %v2779_v60  ;;  %545 = vmatpush2.bf16.msra.mxu1 %v2782_v62 }
  0x3d   :  { %505 = vmatprep.subr.bf16.mxu0 %v2783_v63  ;;  %546 = vmatprep.subr.bf16.mxu1 %v2786_v1 }
  0x40   :  { %506 = vmatpush2.bf16.msra.mxu0 %v2785_v0  ;;  %547 = vmatpush2.bf16.msra.mxu1 %v2788_v2 }
  0x41   :  { %2365 = vmatprep.subr.bf16.mxu0 %v2789_v3  ;;  %2387 = vmatprep.subr.bf16.mxu1 %v2791_v6 }
  0x43   :  { %508 = vmatmul.mubr.bf16.vlgmr.msra.gmra.mxu0 %v67_v5  ;;  %549 = vmatmul.mubr.bf16.vlgmr.msra.gmra.mxu1 %v67_v5 }
  0x44   :  { %2366 = vmatpush3.bf16.msra.mxu0 %v2790_v4  ;;  %2388 = vmatpush3.bf16.msra.mxu1 %v2793_v8 }
  0x45   :  { %2367 = vmatprep.subr.bf16.mxu0 %v2792_v7  ;;  %2389 = vmatprep.subr.bf16.mxu1 %v2795_v10 }
  0x48   :  { %2368 = vmatpush3.bf16.msra.mxu0 %v2794_v9  ;;  %2390 = vmatpush3.bf16.msra.mxu1 %v2797_v12 }
  0x49   :  { %2369 = vmatprep.subr.bf16.mxu0 %v2796_v11  ;;  %2391 = vmatprep.subr.bf16.mxu1 %v2799_v13 }
  0x4c   :  { %2370 = vmatpush3.bf16.msra.mxu0 %v2798_v14  ;;  %2392 = vmatpush3.bf16.msra.mxu1 %v2801_v16 }
  0x4d   :  { %2371 = vmatprep.subr.bf16.mxu0 %v2800_v15  ;;  %2393 = vmatprep.subr.bf16.mxu1 %v2803_v17 }
  0x50   :  { %2372 = vmatpush3.bf16.msra.mxu0 %v2802_v18  ;;  %2394 = vmatpush3.bf16.msra.mxu1 %v2805_v20 }
  0x51   :  { %2373 = vmatprep.subr.bf16.mxu0 %v2804_v19  ;;  %2395 = vmatprep.subr.bf16.mxu1 %v2807_v21 }
  0x54   :  { %2374 = vmatpush3.bf16.msra.mxu0 %v2806_v22  ;;  %2396 = vmatpush3.bf16.msra.mxu1 %v2809_v24 }
  0x55   :  { %2375 = vmatprep.subr.bf16.mxu0 %v2808_v23 }
  0x58   :  { %2376 = vmatpush3.bf16.msra.mxu0 %v2810_v25 }
  0x59   :  { %21 = vsyncpa [#allocation3], 0  ;;  %v2811_v26 = vld [vmem:[%s3732_s5 + $0xd0] sm:$0xff]   ;;  %v2812_v27 = vld [vmem:[%s3732_s5 + $0x48] sm:$0xff]   ;;  %v135_v37 = vlaneseq  ;;  %v2915_v15 = vmov 0.0   ;;  %vm2916_vm0 = vmmov 0  }
  0x5a   :  { %v2813_v28 = vld [vmem:[%s3732_s5 + $0x90] sm:$0xff]   ;;  %2397 = vmatprep.subr.bf16.mxu1 %v2811_v26  ;;  %v2814_v29 = vld [vmem:[%s3732_s5 + $0x8] sm:$0xff]   ;;  %2377 = vmatprep.subr.bf16.mxu0 %v2812_v27  ;;  %v2816_v31 = vld [vmem:[%s3732_s5 + $0x40] sm:$0xff]  }
  0x5b   :  { %2398 = vmatpush3.bf16.msra.mxu1 %v2813_v28  ;;  %v2815_v30 = vld [vmem:[%s3732_s5 + $0xc8] sm:$0xff]   ;;  %v2818_v33 = vld [vmem:[%s3732_s5] sm:$0xff]   ;;  %v2821_v36 = vld [vmem:[%s3734_s7 + $0x38] sm:$0xff]   ;;  %v3298_v38 = vshrl.u32 %v135_v37, 7 }
  0x5c   :  { %2378 = vmatpush3.bf16.msra.mxu0 %v2814_v29  ;;  %v2817_v32 = vld [vmem:[%s3732_s5 + $0x88] sm:$0xff]   ;;  %2399 = vmatprep.subr.bf16.mxu1 %v2815_v30  ;;  %v2819_v34 = vld [vmem:[%s3732_s5 + $0xc0] sm:$0xff]   ;;  %v2822_v2 = vld [vmem:[%s3734_s7 + $0x30] sm:$0xff]  }
  0x5d   :  { %2379 = vmatprep.subr.bf16.mxu0 %v2816_v31  ;;  %v2820_v35 = vld [vmem:[%s3732_s5 + $0x80] sm:$0xff]   ;;  %v137_v39 = vsub.s32 0, %v3298_v38  ;;  %v141_v41 = vsub.s32 1, %v3298_v38  ;;  %v145_v42 = vsub.s32 2, %v3298_v38  ;;  %v149_v44 = vsub.s32 3, %v3298_v38  ;;  %v2823_v6 = vld [vmem:[%s3734_s7 + $0x28] sm:$0xff]  }
  0x5e   :  { %v133_v40 = vld [vmem:[%s3731_s4] sm:$0xf]  ;;  %v2825_v8 = vld [vmem:[%s3734_s7 + $0x18] sm:$0xff]   ;;  %v2826_v9 = vld [vmem:[%s3734_s7 + $0x10] sm:$0xff]  }
  0x5f   :  { %2400 = vmatpush3.bf16.msra.mxu1 %v2817_v32  ;;  %v138_v43 = vrot.slane %v133_v40, %v137_v39  ;;  %v142_v45 = vrot.slane %v133_v40, %v141_v41  ;;  %v146_v46 = vrot.slane %v133_v40, %v145_v42  ;;  %v150_v49 = vrot.slane %v133_v40, %v149_v44  ;;  %v2829_v5 = vld [vmem:[%s3728_s1] sm:$0xff]   ;;  %v2827_v10 = vld [vmem:[%s3734_s7 + $0x8] sm:$0xff]   ;;  %v2831_v13 = vld [vmem:[%s3728_s1 + $0x10] sm:$0xff]  }
  0x60   :  { %2380 = vmatpush3.bf16.msra.mxu0 %v2818_v33  ;;  %2401 = vmatprep.subr.bf16.mxu1 %v2819_v34  ;;  %v2824_v7 = vld [vmem:[%s3734_s7 + $0x20] sm:$0xff]   ;;  %v2830_v12 = vld [vmem:[%s3728_s1 + $0x8] sm:$0xff]   ;;  %v2861_v14 = vld [vmem:[%s3738_s11 + $0x38] sm:$0xff]  }
  0x61   :  { %2529 = vmatprep.subr.bf16.mxu0 %v2821_v36  ;;  %v2828_v11 = vld [vmem:[%s3734_s7] sm:$0xff]   ;;  %v2862_v16 = vld [vmem:[%s3738_s11 + $0x30] sm:$0xff]   ;;  %v2832_v17 = vld [vmem:[%s3728_s1 + $0x18] sm:$0xff]  }
  0x62   :  { %v2833_v18 = vld [vmem:[%s3728_s1 + $0x20] sm:$0xff]   ;;  %v2863_v19 = vld [vmem:[%s3738_s11 + $0x28] sm:$0xff]   ;;  %v2835_v22 = vld [vmem:[%s3728_s1 + $0x30] sm:$0xff]  }
  0x63   :  { %2402 = vmatpush3.bf16.msra.mxu1 %v2820_v35  ;;  %v2864_v20 = vld [vmem:[%s3738_s11 + $0x20] sm:$0xff]   ;;  %v2834_v21 = vld [vmem:[%s3728_s1 + $0x28] sm:$0xff]   ;;  %v2865_v23 = vld [vmem:[%s3738_s11 + $0x18] sm:$0xff]  }
  0x64   :  { %v2836_v24 = vld [vmem:[%s3728_s1 + $0x38] sm:$0xff]   ;;  %v2837_v25 = vld [vmem:[%s3728_s1 + $0x40] sm:$0xff]   ;;  %v2838_v26 = vld [vmem:[%s3728_s1 + $0x48] sm:$0xff]  }
  0x65   :  { %v2839_v27 = vld [vmem:[%s3728_s1 + $0x50] sm:$0xff]   ;;  %v2840_v29 = vld [vmem:[%s3728_s1 + $0x58] sm:$0xff]   ;;  %v2841_v30 = vld [vmem:[%s3728_s1 + $0x60] sm:$0xff]  }
  0x66   :  { %v2866_v28 = vld [vmem:[%s3738_s11 + $0x10] sm:$0xff]   ;;  %v2867_v31 = vld [vmem:[%s3738_s11 + $0x8] sm:$0xff]   ;;  %v2868_v32 = vld [vmem:[%s3738_s11] sm:$0xff]  }
  0x67   :  { %v2842_v33 = vld [vmem:[%s3728_s1 + $0x68] sm:$0xff]   ;;  %v2843_v34 = vld [vmem:[%s3728_s1 + $0x70] sm:$0xff]   ;;  %v2844_v35 = vld [vmem:[%s3728_s1 + $0x78] sm:$0xff]  }
  0x68   :  { %v2846_v37 = vld [vmem:[%s3728_s1 + $0x88] sm:$0xff]   ;;  %v2847_v39 = vld [vmem:[%s3728_s1 + $0x90] sm:$0xff]   ;;  %v2848_v40 = vld [vmem:[%s3728_s1 + $0x98] sm:$0xff]  }
  0x69   :  { %v2849_v41 = vld [vmem:[%s3728_s1 + $0xa0] sm:$0xff]   ;;  %v2850_v42 = vld [vmem:[%s3728_s1 + $0xa8] sm:$0xff]   ;;  %v2852_v44 = vld [vmem:[%s3728_s1 + $0xb8] sm:$0xff]  }
 0x103   :  { %v509_v47 = vpop.f32.mrf.mxu0  ;;  %v550_v51 = vpop.f32.mrf.mxu1 }
 0x104   :  { %v510_v48 = vadd.f32 %v509_v47, %v138_v43  ;;  %v551_v53 = vadd.f32 %v550_v51, %v146_v46  ;;  %v2851_v43 = vld [vmem:[%s3728_s1 + $0xb0] sm:$0xff]   ;;  %v2854_v46 = vld [vmem:[%s3728_s1 + $0xc8] sm:$0xff]  }
 0x105   :  { %v511_v50 = vpop.f32.mrf.mxu0  ;;  %v552_v56 = vpop.f32.mrf.mxu1  ;;  %v2855_v47 = vld [vmem:[%s3728_s1 + $0xd0] sm:$0xff]  }
 0x106   :  { %v512_v52 = vadd.f32 %v511_v50, %v142_v45  ;;  %v557_v54 = vmax.f32 %v510_v48, 0.0  ;;  %v559_v58 = vmax.f32 %v551_v53, 0.0  ;;  %v553_v59 = vadd.f32 %v552_v56, %v150_v49  ;;  %v2853_v45 = vld [vmem:[%s3728_s1 + $0xc0] sm:$0xff]   ;;  %v2856_v48 = vld [vmem:[%s3728_s1 + $0xd8] sm:$0xff]   ;;  %v2858_v50 = vld [vmem:[%s3728_s1 + $0xe8] sm:$0xff]  }
 0x107   :  { %v513_v55 = vpop.f32.mrf.mxu0  ;;  %v554_v61 = vpop.f32.mrf.mxu1  ;;  %v2857_v49 = vld [vmem:[%s3728_s1 + $0xe0] sm:$0xff]   ;;  %v2859_v51 = vld [vmem:[%s3728_s1 + $0xf0] sm:$0xff]  }
 0x108   :  { %v558_v57 = vmax.f32 %v512_v52, 0.0  ;;  %v560_v63 = vmax.f32 %v553_v59, 0.0  ;;  %v561_v0 = vpack.c.bf16 %v557_v54, %v557_v54  ;;  %v563_v1 = vpack.c.bf16 %v559_v58, %v559_v58  ;;  %v2860_v52 = vld [vmem:[%s3728_s1 + $0xf8] sm:$0xff]   ;;  %v2255_v54 = vld [vmem:[%s3733_s6] ss:$0 sm:$0xff] }
 0x109   :  { %v514_v60 = vpop.f32.mrf.mxu0  ;;  %v555_v3 = vpop.f32.mrf.mxu1 }
 0x10a   :  { %v562_v62 = vpack.c.bf16 %v558_v57, %v558_v57  ;;  %v564_v4 = vpack.c.bf16 %v560_v63, %v560_v63 }
 0x10c   :  { %860 = vmatprep.mubr.bf16.mxu0 %v562_v62  ;;  %900 = vmatprep.mubr.bf16.mxu1 %v564_v4  ;;  %v2917_v4 = vmov 1966171168  }
 0x10d   :  { %861 = vmatmul.mubr.bf16.vlgmr.msra.gmra.mxu0 %v561_v0  ;;  %901 = vmatmul.mubr.bf16.vlgmr.msra.gmra.mxu1 %v563_v1 }
 0x10e   :  { %2530 = vmatpush3.bf16.msra.mxu0 %v2821_v36  ;;  %2545 = vmatprep.mubr.bf16.mxu0 %v2829_v5  ;;  %v2845_v36 = vld [vmem:[%s3728_s1 + $0x80] sm:$0xff]   ;;  %v1632_v5 = vunpack.c.l.s4 %v2917_v4 }
 0x10f   :  { %2531 = vmatprep.subr.bf16.mxu0 %v2822_v2 }
 0x112   :  { %2532 = vmatpush3.bf16.msra.mxu0 %v2822_v2 }
 0x113   :  { %2533 = vmatprep.subr.bf16.mxu0 %v2823_v6 }
 0x116   :  { %2534 = vmatpush3.bf16.msra.mxu0 %v2823_v6  ;;  %v1633_v6 = vunpack.c.0.s8 %v1632_v5 }
 0x117   :  { %2535 = vmatprep.subr.bf16.mxu0 %v2824_v7 }
 0x11a   :  { %2536 = vmatpush3.bf16.msra.mxu0 %v2824_v7  ;;  %v2329_v7 = vld.sshfl [vmem:[%s3729_s2] sm:$0x33 pattern:$0x75316420] }
 0x11b   :  { %2537 = vmatprep.subr.bf16.mxu0 %v2825_v8 }
 0x11e   :  { %2538 = vmatpush3.bf16.msra.mxu0 %v2825_v8  ;;  %v1630_v8 = vcombine.high %v2329_v7, %v2329_v7 }
 0x11f   :  { %2539 = vmatprep.subr.bf16.mxu0 %v2826_v9 }
 0x122   :  { %2540 = vmatpush3.bf16.msra.mxu0 %v2826_v9  ;;  %v1636_v9 = vsub.s32 %v1633_v6, %v3298_v38 }
 0x123   :  { %2541 = vmatprep.subr.bf16.mxu0 %v2827_v10 }
 0x126   :  { %2542 = vmatpush3.bf16.msra.mxu0 %v2827_v10  ;;  %v3465_v10 = vrot.slane %v1630_v8, %v1636_v9 }
 0x127   :  { %2543 = vmatprep.subr.bf16.mxu0 %v2828_v11 }
 0x128   :  { %1683 = vmatprep.mubr.bf16.mxu1 %v3465_v10 }
 0x12a   :  { %2544 = vmatpush3.bf16.msra.mxu0 %v2828_v11  ;;  %v3467_v11 = vrot.slane %v2329_v7, %v1636_v9 }
 0x12b   :  { %2649 = vmatprep.subr.bf16.mxu0 %v2915_v15 }
 0x12d   :  { %2546 = vmatmul.mubr.bf16.vlgmr.msra.gmra.mxu0 %v2830_v12 }
 0x12e   :  { %2549 = vmatprep.mubr.bf16.mxu0 %v2831_v13  ;;  %2650 = vmatpush3.bf16.msra.mxu0 %v2861_v14  ;;  %v3473_v13 = vld [vmem:[%s3735_s8] ss:$0 sm:$0xff] }
 0x12f   :  { %2651 = vmatprep.subr.bf16.mxu0 %v2915_v15 }
 0x132   :  { %2652 = vmatpush3.bf16.msra.mxu0 %v2862_v16 }
 0x133   :  { %2653 = vmatprep.subr.bf16.mxu0 %v2915_v15 }
 0x135   :  { %2550 = vmatmul.mubr.bf16.gmra.mxu0 %v2832_v17 }
 0x136   :  { %2553 = vmatprep.mubr.bf16.mxu0 %v2833_v18  ;;  %2654 = vmatpush3.bf16.msra.mxu0 %v2863_v19 }
 0x137   :  { %2655 = vmatprep.subr.bf16.mxu0 %v2915_v15 }
 0x13a   :  { %2656 = vmatpush3.bf16.msra.mxu0 %v2864_v20 }
 0x13b   :  { %2657 = vmatprep.subr.bf16.mxu0 %v2915_v15 }
 0x13d   :  { %2554 = vmatmul.mubr.bf16.gmra.mxu0 %v2834_v21 }
 0x13e   :  { %2557 = vmatprep.mubr.bf16.mxu0 %v2835_v22  ;;  %2658 = vmatpush3.bf16.msra.mxu0 %v2865_v23 }
 0x13f   :  { %2659 = vmatprep.subr.bf16.mxu0 %v2915_v15 }
 0x142   :  { %2660 = vmatpush3.bf16.msra.mxu0 %v2866_v28 }
 0x143   :  { %2661 = vmatprep.subr.bf16.mxu0 %v2915_v15 }
 0x145   :  { %2558 = vmatmul.mubr.bf16.gmra.mxu0 %v2836_v24 }
 0x146   :  { %2561 = vmatprep.mubr.bf16.mxu0 %v2837_v25  ;;  %2662 = vmatpush3.bf16.msra.mxu0 %v2867_v31 }
 0x147   :  { %2663 = vmatprep.subr.bf16.mxu0 %v2915_v15 }
 0x14a   :  { %2664 = vmatpush3.bf16.msra.mxu0 %v2868_v32 }
 0x14d   :  { %2562 = vmatmul.mubr.bf16.gmra.mxu0 %v2838_v26 }
 0x14e   :  { %2565 = vmatprep.mubr.bf16.mxu0 %v2839_v27 }
 0x155   :  { %2566 = vmatmul.mubr.bf16.gmra.mxu0 %v2840_v29 }
 0x156   :  { %2569 = vmatprep.mubr.bf16.mxu0 %v2841_v30 }
 0x15d   :  { %2570 = vmatmul.mubr.bf16.gmra.mxu0 %v2842_v33 }
 0x15e   :  { %2573 = vmatprep.mubr.bf16.mxu0 %v2843_v34 }
 0x165   :  { %2574 = vmatmul.mubr.bf16.gmra.mxu0 %v2844_v35 }
 0x166   :  { %2577 = vmatprep.mubr.bf16.mxu0 %v2845_v36 }
 0x16d   :  { %2578 = vmatmul.mubr.bf16.gmra.mxu0 %v2846_v37 }
 0x16e   :  { %2581 = vmatprep.mubr.bf16.mxu0 %v2847_v39 }
 0x175   :  { %2582 = vmatmul.mubr.bf16.gmra.mxu0 %v2848_v40 }
 0x176   :  { %2585 = vmatprep.mubr.bf16.mxu0 %v2849_v41 }
 0x17d   :  { %2586 = vmatmul.mubr.bf16.gmra.mxu0 %v2850_v42 }
 0x17e   :  { %2589 = vmatprep.mubr.bf16.mxu0 %v2851_v43 }
 0x185   :  { %2590 = vmatmul.mubr.bf16.gmra.mxu0 %v2852_v44 }
 0x186   :  { %2593 = vmatprep.mubr.bf16.mxu0 %v2853_v45 }
 0x18d   :  { %2594 = vmatmul.mubr.bf16.gmra.mxu0 %v2854_v46 }
 0x18e   :  { %2597 = vmatprep.mubr.bf16.mxu0 %v2855_v47 }
 0x195   :  { %2598 = vmatmul.mubr.bf16.gmra.mxu0 %v2856_v48 }
 0x196   :  { %2601 = vmatprep.mubr.bf16.mxu0 %v2857_v49 }
 0x19d   :  { %2602 = vmatmul.mubr.bf16.gmra.mxu0 %v2858_v50 }
 0x19e   :  { %2605 = vmatprep.mubr.bf16.mxu0 %v2859_v51 }
 0x1a5   :  { %2606 = vmatmul.mubr.bf16.gmra.mxu0 %v2860_v52 }
 0x1a6   :  { %2665 = vmatprep.mubr.msk.bf16.mxu0 %vm2916_vm0, %v2915_v15 }
 0x1cd   :  { %v2381_v53 = vpop.f32.mrf.mxu0  ;;  %v2403_v56 = vpop.f32.mrf.mxu1 }
 0x1cf   :  { %v2382_v55 = vpop.f32.mrf.mxu0  ;;  %v2404_v59 = vpop.f32.mrf.mxu1 }
 0x1d0   :  { %v2383_v57 = vadd.f32 %v2382_v55, %v2381_v53  ;;  %v2405_v61 = vadd.f32 %v2404_v59, %v2403_v56 }
 0x1d1   :  { %v2384_v58 = vpop.f32.mrf.mxu0  ;;  %v2406_v63 = vpop.f32.mrf.mxu1 }
 0x1d2   :  { %v863_v60 = vadd.f32 %v2383_v57, %v2255_v54 }
 0x1d3   :  { %v2385_v62 = vpop.f32.mrf.mxu0  ;;  %v2407_v1 = vpop.f32.mrf.mxu1 }
 0x1d4   :  { %v903_v0 = vadd.f32 %v2405_v61, %v863_v60 }
 0x1d6   :  { %v908_v2 = vmax.f32 %v903_v0, 0.0 }
 0x1d8   :  { %v1844_v3 = vpack.c.bf16 %v908_v2, %v908_v2 }
 0x1da   :  { %2666 = vmatmul.mubr.bf16.vlgmr.msra.gmra.mxu0 %v1844_v3 }
 0x1ed   :  { %v2547_v12 = vpop.f32.mrf.mxu0 }
 0x1ee   :  { %v1279_v16 = vadd.f32 %v2547_v12, %v3473_v13 }
 0x1ef   :  { %v1270_v14 = vpop.f32.mrf.mxu0 }
 0x1f0   :  { %v1271_v18 = vadd.f32 %v3473_v13, %v1270_v14  ;;  %v1527_v20 = vmax.f32 %v1279_v16, 0.0 }
 0x1f1   :  { %v2548_v17 = vpop.f32.mrf.mxu0 }
 0x1f2   :  { %v1282_v38 = vadd.f32 %v2548_v17, %v3473_v13  ;;  %v1525_v24 = vmax.f32 %v1271_v18, 0.0 }
 0x1f3   :  { %v1273_v19 = vpop.f32.mrf.mxu0 }
 0x1f4   :  { %v1528_v21 = vmax.f32 %v1282_v38, 0.0  ;;  %v1274_v22 = vadd.f32 %v3473_v13, %v1273_v19 }
 0x1f5   :  { %v2551_v23 = vpop.f32.mrf.mxu0 }
 0x1f6   :  { %v3479_v25 = vpack.c.bf16 %v1528_v21, %v1527_v20  ;;  %v1526_v26 = vmax.f32 %v1274_v22, 0.0  ;;  %v1295_v29 = vadd.f32 %v2551_v23, %v3473_v13 }
 0x1f7   :  { %v1286_v27 = vpop.f32.mrf.mxu0 }
 0x1f8   :  { %v3481_v28 = vpack.c.bf16 %v1526_v26, %v1525_v24  ;;  %v1287_v31 = vadd.f32 %v3473_v13, %v1286_v27  ;;  %v1531_v34 = vmax.f32 %v1295_v29, 0.0 }
 0x1f9   :  { %v2552_v30 = vpop.f32.mrf.mxu0 }
 0x1fa   :  { %v1298_v32 = vadd.f32 %v2552_v30, %v3473_v13  ;;  %v1529_v39 = vmax.f32 %v1287_v31, 0.0 }
 0x1fb   :  { %v1289_v33 = vpop.f32.mrf.mxu0 }
 0x1fc   :  { %v1532_v35 = vmax.f32 %v1298_v32, 0.0  ;;  %v1290_v36 = vadd.f32 %v3473_v13, %v1289_v33 }
 0x1fd   :  { %v2555_v37 = vpop.f32.mrf.mxu0 }
 0x1fe   :  { %v3487_v40 = vpack.c.bf16 %v1532_v35, %v1531_v34  ;;  %v1530_v41 = vmax.f32 %v1290_v36, 0.0  ;;  %v1311_v33 = vadd.f32 %v2555_v37, %v3473_v13 }
 0x1ff   :  { %v3489_v42 = vpop.f32.mrf.mxu0 }
 0x200   :  { %v3491_v43 = vpack.c.bf16 %v1530_v41, %v1529_v39 }
 0x201   :  { %v2556_v44 = vpop.f32.mrf.mxu0 }
 0x202   :  { %v1314_v20 = vadd.f32 %v2556_v44, %v3473_v13 }
 0x203   :  { %v1305_v45 = vpop.f32.mrf.mxu0 }
 0x204   :  { %v1536_v39 = vmax.f32 %v1314_v20, 0.0 }
 0x205   :  { %v2559_v46 = vpop.f32.mrf.mxu0 }
 0x206   :  { %v1327_v2 = vadd.f32 %v2559_v46, %v3473_v13 }
 0x207   :  { %v1318_v47 = vpop.f32.mrf.mxu0 }
 0x208   :  { %v1539_v17 = vmax.f32 %v1327_v2, 0.0  ;;  %v1319_v18 = vadd.f32 %v3473_v13, %v1318_v47  ;;  %v1306_v47 = vadd.f32 %v3473_v13, %v1305_v45 }
 0x209   :  { %v2560_v48 = vpop.f32.mrf.mxu0 }
 0x20a   :  { %v1330_v63 = vadd.f32 %v2560_v48, %v3473_v13  ;;  %v1537_v34 = vmax.f32 %v1319_v18, 0.0 }
 0x20b   :  { %v1321_v49 = vpop.f32.mrf.mxu0 }
 0x20c   :  { %v1540_v6 = vmax.f32 %v1330_v63, 0.0  ;;  %v1322_v7 = vadd.f32 %v3473_v13, %v1321_v49 }
 0x20d   :  { %v3493_v50 = vpop.f32.mrf.mxu0 }
 0x20e   :  { %v1597_v24 = vpack.c.bf16 %v1540_v6, %v1539_v17  ;;  %v1538_v26 = vmax.f32 %v1322_v7, 0.0  ;;  %v1534_v6 = vmax.f32 %v1306_v47, 0.0 }
 0x20f   :  { %v3495_v51 = vpop.f32.mrf.mxu0 }
 0x210   :  { %v1596_v48 = vpack.c.bf16 %v1538_v26, %v1537_v34 }
 0x211   :  { %v3497_v52 = vpop.f32.mrf.mxu0 }
 0x213   :  { %v3499_v53 = vpop.f32.mrf.mxu0 }
 0x215   :  { %v2567_v54 = vpop.f32.mrf.mxu0 }
 0x217   :  { %v3501_v55 = vpop.f32.mrf.mxu0 }
 0x218   :  { %v1351_v18 = vadd.f32 %v3473_v13, %v3501_v55 }
 0x219   :  { %v2568_v56 = vpop.f32.mrf.mxu0 }
 0x21a   :  { %v1362_v49 = vadd.f32 %v2568_v56, %v3473_v13 }
 0x21b   :  { %v3503_v57 = vpop.f32.mrf.mxu0 }
 0x21c   :  { %v1548_v7 = vmax.f32 %v1362_v49, 0.0 }
 0x21d   :  { %v2571_v58 = vpop.f32.mrf.mxu0 }
 0x21e   :  { %v1375_v38 = vadd.f32 %v2571_v58, %v3473_v13 }
 0x21f   :  { %v1366_v59 = vpop.f32.mrf.mxu0 }
 0x220   :  { %v1551_v35 = vmax.f32 %v1375_v38, 0.0  ;;  %v1367_v41 = vadd.f32 %v3473_v13, %v1366_v59  ;;  %v1303_v59 = vadd.f32 %v3473_v13, %v3489_v42 }
 0x221   :  { %v2572_v60 = vpop.f32.mrf.mxu0 }
 0x222   :  { %v1378_v8 = vadd.f32 %v2572_v60, %v3473_v13 }
 0x223   :  { %v1369_v61 = vpop.f32.mrf.mxu0 }
 0x224   :  { %v1552_v27 = vmax.f32 %v1378_v8, 0.0  ;;  %v1370_v30 = vadd.f32 %v3473_v13, %v1369_v61 }
 0x225   :  { %v2575_v62 = vpop.f32.mrf.mxu0 }
 0x226   :  { %v1391_v1 = vadd.f32 %v2575_v62, %v3473_v13  ;;  %v1603_v58 = vpack.c.bf16 %v1552_v27, %v1551_v35  ;;  %v1550_v37 = vmax.f32 %v1370_v30, 0.0  ;;  %v1545_v30 = vmax.f32 %v1351_v18, 0.0 }
 0x227   :  { %v1382_v0 = vpop.f32.mrf.mxu0  ;;  %v1338_v35 = vadd.f32 %v3473_v13, %v3499_v53 }
 0x228   :  { %v1383_v4 = vadd.f32 %v3473_v13, %v1382_v0  ;;  %v1555_v12 = vmax.f32 %v1391_v1, 0.0  ;;  %v1535_v0 = vmax.f32 %v1311_v33, 0.0  ;;  %v1359_v1 = vadd.f32 %v2567_v54, %v3473_v13 }
 0x229   :  { %v2576_v3 = vpop.f32.mrf.mxu0  ;;  %v1533_v54 = vmax.f32 %v1303_v59, 0.0 }
 0x22a   :  { %v1394_v5 = vadd.f32 %v2576_v3, %v3473_v13  ;;  %v1553_v21 = vmax.f32 %v1383_v4, 0.0  ;;  %v1549_v3 = vmax.f32 %v1367_v41, 0.0 }
 0x22b   :  { %v1385_v9 = vpop.f32.mrf.mxu0  ;;  %v1594_v20 = vpack.c.bf16 %v1534_v6, %v1533_v54 }
 0x22c   :  { %v1556_v14 = vmax.f32 %v1394_v5, 0.0  ;;  %v1386_v16 = vadd.f32 %v3473_v13, %v1385_v9  ;;  %v1595_v5 = vpack.c.bf16 %v1536_v39, %v1535_v0  ;;  %v1354_v9 = vadd.f32 %v3473_v13, %v3503_v57 }
 0x22d   :  { %v2579_v19 = vpop.f32.mrf.mxu0  ;;  %v1346_v57 = vadd.f32 %v3497_v52, %v3473_v13 }
 0x22e   :  { %v1605_v22 = vpack.c.bf16 %v1556_v14, %v1555_v12  ;;  %v1554_v23 = vmax.f32 %v1386_v16, 0.0  ;;  %v1407_v32 = vadd.f32 %v2579_v19, %v3473_v13  ;;  %v1602_v12 = vpack.c.bf16 %v1550_v37, %v1549_v3 }
 0x22f   :  { %v1398_v29 = vpop.f32.mrf.mxu0  ;;  %v1547_v16 = vmax.f32 %v1359_v1, 0.0  ;;  %v1544_v34 = vmax.f32 %v1346_v57, 0.0 }
 0x230   :  { %v1604_v31 = vpack.c.bf16 %v1554_v23, %v1553_v21  ;;  %2449 = vmatprep.subr.bf16.mxu1 %v1605_v22  ;;  %v1399_v44 = vadd.f32 %v3473_v13, %v1398_v29  ;;  %v1559_v61 = vmax.f32 %v1407_v32, 0.0  ;;  %v1546_v23 = vmax.f32 %v1354_v9, 0.0 }
 0x231   :  { %v2580_v36 = vpop.f32.mrf.mxu0  ;;  %2450 = vmatpush3.bf16.msra.mxu1 %v1597_v24  ;;  %v1601_v21 = vpack.c.bf16 %v1548_v7, %v1547_v16  ;;  %v1343_v29 = vadd.f32 %v3493_v50, %v3473_v13 }
 0x232   :  { %v1410_v46 = vadd.f32 %v2580_v36, %v3473_v13  ;;  %2451 = vmatprep.subr.bf16.mxu1 %v1604_v31  ;;  %v1557_v45 = vmax.f32 %v1399_v44, 0.0  ;;  %v1600_v36 = vpack.c.bf16 %v1546_v23, %v1545_v30  ;;  %v1335_v44 = vadd.f32 %v3473_v13, %v3495_v51 }
 0x233   :  { %v1401_v60 = vpop.f32.mrf.mxu0  ;;  %v1543_v50 = vmax.f32 %v1343_v29, 0.0  ;;  %v1646_v51 = vcombine.high %v3465_v10, %v3465_v10 }
 0x234   :  { %v1560_v62 = vmax.f32 %v1410_v46, 0.0  ;;  %v1402_v63 = vadd.f32 %v3473_v13, %v1401_v60 }
 0x235   :  { %v2583_v2 = vpop.f32.mrf.mxu0  ;;  %2452 = vmatpush3.bf16.msra.mxu1 %v1596_v48  ;;  %v1599_v47 = vpack.c.bf16 %v1544_v34, %v1543_v50  ;;  %v1542_v48 = vmax.f32 %v1338_v35, 0.0 }
 0x236   :  { %v3528_v4 = vpack.c.bf16 %v1560_v62, %v1559_v61  ;;  %v1558_v56 = vmax.f32 %v1402_v63, 0.0  ;;  %2453 = vmatprep.subr.bf16.mxu1 %v1603_v58  ;;  %v1423_v42 = vadd.f32 %v2583_v2, %v3473_v13  ;;  %v1541_v58 = vmax.f32 %v1335_v44, 0.0 }
 0x237   :  { %v1414_v8 = vpop.f32.mrf.mxu0 }
 0x238   :  { %v3532_v14 = vpack.c.bf16 %v1558_v56, %v1557_v45  ;;  %v1415_v38 = vadd.f32 %v3473_v13, %v1414_v8  ;;  %v1563_v24 = vmax.f32 %v1423_v42, 0.0  ;;  %v1598_v60 = vpack.c.bf16 %v1542_v48, %v1541_v58 }
 0x239   :  { %v2584_v17 = vpop.f32.mrf.mxu0  ;;  %2454 = vmatpush3.bf16.msra.mxu1 %v1595_v5 }
 0x23a   :  { %v1426_v19 = vadd.f32 %v2584_v17, %v3473_v13  ;;  %2455 = vmatprep.subr.bf16.mxu1 %v1602_v12  ;;  %v1561_v31 = vmax.f32 %v1415_v38, 0.0 }
 0x23b   :  { %v1417_v22 = vpop.f32.mrf.mxu0 }
 0x23c   :  { %v1564_v26 = vmax.f32 %v1426_v19, 0.0  ;;  %v1418_v27 = vadd.f32 %v3473_v13, %v1417_v22 }
 0x23d   :  { %v3544_v55 = vpop.f32.mrf.mxu0  ;;  %2456 = vmatpush3.bf16.msra.mxu1 %v1594_v20 }
 0x23e   :  { %v3546_v32 = vpack.c.bf16 %v1564_v26, %v1563_v24  ;;  %v1562_v33 = vmax.f32 %v1418_v27, 0.0  ;;  %2457 = vmatprep.subr.bf16.mxu1 %v1601_v21  ;;  %v1439_v34 = vadd.f32 %v3544_v55, %v3473_v13 }
 0x23f   :  { %v3548_v52 = vpop.f32.mrf.mxu0 }
 0x240   :  { %v3552_v39 = vpack.c.bf16 %v1562_v33, %v1561_v31 }
 0x241   :  { %v2588_v41 = vpop.f32.mrf.mxu0  ;;  %2458 = vmatpush3.bf16.msra.mxu1 %v3487_v40 }
 0x242   :  { %2459 = vmatprep.subr.bf16.mxu1 %v1600_v36  ;;  %v1442_v26 = vadd.f32 %v2588_v41, %v3473_v13 }
 0x243   :  { %v3557_v46 = vpop.f32.mrf.mxu0 }
 0x244   :  { %v1568_v44 = vmax.f32 %v1442_v26, 0.0  ;;  %v1434_v41 = vadd.f32 %v3473_v13, %v3557_v46 }
 0x245   :  { %v2591_v49 = vpop.f32.mrf.mxu0  ;;  %2460 = vmatpush3.bf16.msra.mxu1 %v3491_v43 }
 0x246   :  { %2461 = vmatprep.subr.bf16.mxu1 %v1599_v47  ;;  %v1455_v7 = vadd.f32 %v2591_v49, %v3473_v13 }
 0x247   :  { %v1446_v53 = vpop.f32.mrf.mxu0 }
 0x248   :  { %v1571_v20 = vmax.f32 %v1455_v7, 0.0  ;;  %v1447_v57 = vadd.f32 %v3473_v13, %v1446_v53  ;;  %v1567_v53 = vmax.f32 %v1439_v34, 0.0  ;;  %v2878_v34 = vld [vmem:[%s3739_s12 + $0x30] sm:$0xff]  }
 0x249   :  { %v2592_v37 = vpop.f32.mrf.mxu0  ;;  %2462 = vmatpush3.bf16.msra.mxu1 %v3479_v25 }
 0x24a   :  { %2463 = vmatprep.subr.bf16.mxu1 %v1598_v60  ;;  %v1458_v10 = vadd.f32 %v2592_v37, %v3473_v13  ;;  %v1569_v35 = vmax.f32 %v1447_v57, 0.0  ;;  %v1431_v60 = vadd.f32 %v3473_v13, %v3548_v52 }
 0x24b   :  { %v1449_v40 = vpop.f32.mrf.mxu0 }
 0x24c   :  { %v1572_v42 = vmax.f32 %v1458_v10, 0.0  ;;  %v1450_v54 = vadd.f32 %v3473_v13, %v1449_v40  ;;  %v1611_v40 = vpack.c.bf16 %v1568_v44, %v1567_v53  ;;  %v2882_v44 = vld [vmem:[%s3739_s12 + $0x10] sm:$0xff]  }
 0x24d   :  { %v3561_v61 = vpop.f32.mrf.mxu0  ;;  %2464 = vmatpush3.bf16.msra.mxu1 %v3481_v28 }
 0x24e   :  { %v1613_v27 = vpack.c.bf16 %v1572_v42, %v1571_v20  ;;  %v1570_v29 = vmax.f32 %v1450_v54, 0.0  ;;  %v2872_v54 = vld [vmem:[%s3736_s9 + $0x20] sm:$0xff]  }
 0x24f   :  { %v3566_v62 = vpop.f32.mrf.mxu0 }
 0x250   :  { %1684 = vmatmul.mubr.bf16.vlgmr.msra.gmra.mxu1 %v3467_v11  ;;  %v1612_v47 = vpack.c.bf16 %v1570_v29, %v1569_v35  ;;  %v2879_v35 = vld [vmem:[%s3739_s12 + $0x28] sm:$0xff]  }
 0x251   :  { %v3569_v43 = vpop.f32.mrf.mxu0  ;;  %1723 = vmatprep.mubr.bf16.mxu1 %v1646_v51  ;;  %v1566_v51 = vmax.f32 %v1434_v41, 0.0  ;;  %v2883_v41 = vld [vmem:[%s3739_s12 + $0x8] sm:$0xff]  }
 0x252   :  { %v1474_v52 = vadd.f32 %v3569_v43, %v3473_v13 }
 0x253   :  { %v3571_v63 = vpop.f32.mrf.mxu0 }
 0x254   :  { %v1466_v7 = vadd.f32 %v3473_v13, %v3571_v63  ;;  %v1645_v63 = vcombine.high %v3467_v11, %v3467_v11 }
 0x255   :  { %v2599_v0 = vpop.f32.mrf.mxu0 }
 0x256   :  { %v1487_v55 = vadd.f32 %v2599_v0, %v3473_v13 }
 0x257   :  { %v1478_v25 = vpop.f32.mrf.mxu0 }
 0x259   :  { %v2600_v59 = vpop.f32.mrf.mxu0 }
 0x25a   :  { %v1490_v48 = vadd.f32 %v2600_v59, %v3473_v13  ;;  %v1579_v59 = vmax.f32 %v1487_v55, 0.0 }
 0x25b   :  { %v1481_v1 = vpop.f32.mrf.mxu0 }
 0x25d   :  { %v2603_v2 = vpop.f32.mrf.mxu0 }
 0x25e   :  { %v1503_v21 = vadd.f32 %v2603_v2, %v3473_v13  ;;  %v1580_v2 = vmax.f32 %v1490_v48, 0.0  ;;  %v2330_v48 = vld [vmem:[%s3737_s10] ss:$0 sm:$0xff] }
 0x25f   :  { %v1494_v3 = vpop.f32.mrf.mxu0 }
 0x260   :  { %v1583_v36 = vmax.f32 %v1503_v21, 0.0  ;;  %v1495_v50 = vadd.f32 %v3473_v13, %v1494_v3  ;;  %v1482_v3 = vadd.f32 %v3473_v13, %v1481_v1  ;;  %v1617_v10 = vpack.c.bf16 %v1580_v2, %v1579_v59  ;;  %v2886_v2 = vld [vmem:[%s3741_s14 + $0x30] sm:$0xff]  }
 0x261   :  { %v2604_v45 = vpop.f32.mrf.mxu0  ;;  %v1576_v1 = vmax.f32 %v1474_v52, 0.0  ;;  %v2890_v59 = vld [vmem:[%s3741_s14 + $0x10] sm:$0xff]  }
 0x262   :  { %v1506_v17 = vadd.f32 %v2604_v45, %v3473_v13  ;;  %v1581_v37 = vmax.f32 %v1495_v50, 0.0  ;;  %v1565_v45 = vmax.f32 %v1431_v60, 0.0  ;;  %v1578_v0 = vmax.f32 %v1482_v3, 0.0  ;;  %v2881_v50 = vld [vmem:[%s3739_s12 + $0x18] sm:$0xff]   ;;  %v2887_v3 = vld [vmem:[%s3741_s14 + $0x28] sm:$0xff]  }
 0x263   :  { %v1497_v28 = vpop.f32.mrf.mxu0 }
 0x264   :  { %v1584_v30 = vmax.f32 %v1506_v17, 0.0  ;;  %v1498_v31 = vadd.f32 %v3473_v13, %v1497_v28  ;;  %v1479_v28 = vadd.f32 %v3473_v13, %v1478_v25  ;;  %v2874_v17 = vld [vmem:[%s3736_s9 + $0x10] sm:$0xff]  }
 0x265   :  { %v2607_v56 = vpop.f32.mrf.mxu0 }
 0x266   :  { %v1519_v6 = vadd.f32 %v2607_v56, %v3473_v13  ;;  %v1619_v49 = vpack.c.bf16 %v1584_v30, %v1583_v36  ;;  %v1582_v58 = vmax.f32 %v1498_v31, 0.0  ;;  %v1610_v56 = vpack.c.bf16 %v1566_v51, %v1565_v45  ;;  %v2877_v31 = vld [vmem:[%s3739_s12 + $0x38] sm:$0xff]   ;;  %v2880_v36 = vld [vmem:[%s3739_s12 + $0x20] sm:$0xff]  }
 0x267   :  { %v1510_v5 = vpop.f32.mrf.mxu0  ;;  %v2889_v45 = vld [vmem:[%s3741_s14 + $0x18] sm:$0xff]  }
 0x268   :  { %v1511_v9 = vadd.f32 %v3473_v13, %v1510_v5  ;;  %v1587_v18 = vmax.f32 %v1519_v6, 0.0  ;;  %v1618_v46 = vpack.c.bf16 %v1582_v58, %v1581_v37  ;;  %v1471_v5 = vadd.f32 %v3561_v61, %v3473_v13  ;;  %v2885_v37 = vld [vmem:[%s3741_s14 + $0x38] sm:$0xff]  }
 0x269   :  { %v2608_v8 = vpop.f32.mrf.mxu0  ;;  %v1577_v6 = vmax.f32 %v1479_v28, 0.0  ;;  %v2891_v28 = vld [vmem:[%s3741_s14 + $0x8] sm:$0xff]  }
 0x26a   :  { %v1522_v12 = vadd.f32 %v2608_v8, %v3473_v13  ;;  %v1585_v22 = vmax.f32 %v1511_v9, 0.0  ;;  %v1575_v25 = vmax.f32 %v1471_v5, 0.0  ;;  %v1463_v9 = vadd.f32 %v3473_v13, %v3566_v62 }
 0x26b   :  { %v1513_v16 = vpop.f32.mrf.mxu0  ;;  %v1616_v8 = vpack.c.bf16 %v1578_v0, %v1577_v6 }
 0x26c   :  { %v1588_v38 = vmax.f32 %v1522_v12, 0.0  ;;  %v1514_v19 = vadd.f32 %v3473_v13, %v1513_v16  ;;  %v1615_v43 = vpack.c.bf16 %v1576_v1, %v1575_v25  ;;  %v1574_v12 = vmax.f32 %v1466_v7, 0.0  ;;  %v2869_v13 = vld [vmem:[%s3736_s9 + $0x38] sm:$0xff]  }
 0x26d   :  { %v1573_v42 = vmax.f32 %v1463_v9, 0.0  ;;  %v2873_v16 = vld [vmem:[%s3736_s9 + $0x18] sm:$0xff]  }
 0x26e   :  { %v1621_v23 = vpack.c.bf16 %v1588_v38, %v1587_v18  ;;  %v1586_v24 = vmax.f32 %v1514_v19, 0.0  ;;  %v2875_v18 = vld [vmem:[%s3736_s9 + $0x8] sm:$0xff]   ;;  %v2876_v38 = vld [vmem:[%s3736_s9] sm:$0xff]  }
 0x26f   :  { %v1614_v61 = vpack.c.bf16 %v1574_v12, %v1573_v42 }
 0x270   :  { %v1620_v33 = vpack.c.bf16 %v1586_v24, %v1585_v22  ;;  %2471 = vmatprep.subr.bf16.mxu1 %v1621_v23 }
 0x271   :  { %2472 = vmatpush3.bf16.msra.mxu1 %v1613_v27 }
 0x272   :  { %2473 = vmatprep.subr.bf16.mxu1 %v1620_v33 }
 0x275   :  { %2474 = vmatpush3.bf16.msra.mxu1 %v1612_v47  ;;  %v2884_v47 = vld [vmem:[%s3739_s12] sm:$0xff]  }
 0x276   :  { %2475 = vmatprep.subr.bf16.mxu1 %v1619_v49 }
 0x279   :  { %2476 = vmatpush3.bf16.msra.mxu1 %v1611_v40 }
 0x27a   :  { %2477 = vmatprep.subr.bf16.mxu1 %v1618_v46  ;;  %v2888_v46 = vld [vmem:[%s3741_s14 + $0x20] sm:$0xff]  }
 0x27d   :  { %2478 = vmatpush3.bf16.msra.mxu1 %v1610_v56  ;;  %v2892_v56 = vld [vmem:[%s3741_s14] sm:$0xff]   ;;  %s2918_s14 = smov [#allocation2]  }
 0x27e   :  { %2479 = vmatprep.subr.bf16.mxu1 %v1617_v10  ;;  %v2355_v10 = vld [vmem:[%s3740_s13] ss:$0 sm:$0xff]  ;;  %s2182_s21 = sshll.u32 %s2918_s14, 4  ;;  %s2183_s21 = int_to_ptr.vmem [resolvable:$true] %s2182_s21 }
 0x27f   :  { %s2893_s13 = scalar_lea.vmem %s2183_s21, 32  ;;  %p2898_p1 = scmp.lt.s32.totalorder %s2183_s21, %s2183_s21 }
 0x280   :  { %p2894_p0 = scmp.ne.s32.totalorder %s2183_s21, %s2893_s13  ;;  %p2899_p2 = scmp.lt.s32.totalorder %s2893_s13, %s2893_s13 }
 0x281   :  { %2480 = vmatpush3.bf16.msra.mxu1 %v3546_v32  ;;  %v2871_v32 = vld [vmem:[%s3736_s9 + $0x28] sm:$0xff]  }
 0x282   :  { %2481 = vmatprep.subr.bf16.mxu1 %v1616_v8  ;;  %p2900_p3 = por %p2899_p2, %p2898_p1 }
 0x284   :  { %p2901_p4 = pnand %p2900_p3, %p2894_p0 }
 0x285   :  { %2482 = vmatpush3.bf16.msra.mxu1 %v3552_v39 }
 0x286   :  { %2483 = vmatprep.subr.bf16.mxu1 %v1615_v43 }
 0x289   :  { %2484 = vmatpush3.bf16.msra.mxu1 %v3528_v4  ;;  %v2870_v4 = vld [vmem:[%s3736_s9 + $0x30] sm:$0xff]  }
 0x28a   :  { %2485 = vmatprep.subr.bf16.mxu1 %v1614_v61 }
 0x28d   :  { %2486 = vmatpush3.bf16.msra.mxu1 %v3532_v14 }
 0x28e   :  { %2609 = vmatprep.subr.bf16.mxu1 %v2915_v15 }
 0x290   :  { %1724 = vmatmul.mubr.bf16.vlgmr.msra.gmra.mxu1 %v1645_v63 }
 0x291   :  { %2625 = vmatprep.mubr.msk.bf16.mxu1 %vm2916_vm0, %v2915_v15  ;;  %2610 = vmatpush3.bf16.msra.mxu1 %v2869_v13 }
 0x292   :  { %2611 = vmatprep.subr.bf16.mxu1 %v2915_v15 }
 0x295   :  { %2612 = vmatpush3.bf16.msra.mxu1 %v2870_v4 }
 0x296   :  { %2613 = vmatprep.subr.bf16.mxu1 %v2915_v15 }
 0x299   :  { %2614 = vmatpush3.bf16.msra.mxu1 %v2871_v32 }
 0x29a   :  { %v3620_v11 = vpop.f32.mrf.mxu0  ;;  %2615 = vmatprep.subr.bf16.mxu1 %v2915_v15 }
 0x29c   :  { %v2667_v14 = vpop.f32.mrf.mxu0 }
 0x29d   :  { %2616 = vmatpush3.bf16.msra.mxu1 %v2872_v54 }
 0x29e   :  { %v2051_v39 = vpop.f32.mrf.mxu0  ;;  %2617 = vmatprep.subr.bf16.mxu1 %v2915_v15 }
 0x2a0   :  { %v2668_v62 = vpop.f32.mrf.mxu0 }
 0x2a1   :  { %2618 = vmatpush3.bf16.msra.mxu1 %v2873_v16 }
 0x2a2   :  { %2619 = vmatprep.subr.bf16.mxu1 %v2915_v15 }
 0x2a5   :  { %2620 = vmatpush3.bf16.msra.mxu1 %v2874_v17 }
 0x2a6   :  { %2621 = vmatprep.subr.bf16.mxu1 %v2915_v15 }
 0x2a9   :  { %2622 = vmatpush3.bf16.msra.mxu1 %v2875_v18 }
 0x2aa   :  { %2623 = vmatprep.subr.bf16.mxu1 %v2915_v15 }
 0x2ad   :  { %2624 = vmatpush3.bf16.msra.mxu1 %v2876_v38 }
 0x2ae   :  { %2629 = vmatprep.subr.bf16.mxu1 %v2915_v15 }
 0x310   :  { %v2465_v19 = vpop.f32.mrf.mxu1 }
 0x312   :  { %v2466_v20 = vpop.f32.mrf.mxu1 }
 0x313   :  { %v2467_v57 = vadd.f32 %v2466_v20, %v2465_v19 }
 0x314   :  { %v2468_v21 = vpop.f32.mrf.mxu1 }
 0x316   :  { %v2469_v22 = vpop.f32.mrf.mxu1 }
 0x350   :  { %v2487_v23 = vpop.f32.mrf.mxu1 }
 0x352   :  { %v2488_v24 = vpop.f32.mrf.mxu1 }
 0x353   :  { %v2489_v26 = vadd.f32 %v2488_v24, %v2487_v23 }
 0x354   :  { %v2490_v27 = vpop.f32.mrf.mxu1 }
 0x355   :  { %v1726_v29 = vadd.f32 %v2489_v26, %v2467_v57 }
 0x356   :  { %v2491_v30 = vpop.f32.mrf.mxu1 }
 0x357   :  { %v1731_v33 = vpack.c.bf16 %v1726_v29, %v1726_v29 }
 0x359   :  { %2626 = vmatmul.mubr.bf16.vlgmr.msra.gmra.mxu1 %v1731_v33 }
 0x35a   :  { %2630 = vmatpush3.bf16.msra.mxu1 %v2877_v31  ;;  %2645 = vmatprep.mubr.msk.bf16.mxu1 %vm2916_vm0, %v2915_v15 }
 0x35b   :  { %2631 = vmatprep.subr.bf16.mxu1 %v2915_v15 }
 0x35e   :  { %2632 = vmatpush3.bf16.msra.mxu1 %v2878_v34 }
 0x35f   :  { %2633 = vmatprep.subr.bf16.mxu1 %v2915_v15 }
 0x362   :  { %2634 = vmatpush3.bf16.msra.mxu1 %v2879_v35 }
 0x363   :  { %2635 = vmatprep.subr.bf16.mxu1 %v2915_v15 }
 0x366   :  { %2636 = vmatpush3.bf16.msra.mxu1 %v2880_v36 }
 0x367   :  { %2637 = vmatprep.subr.bf16.mxu1 %v2915_v15 }
 0x36a   :  { %2638 = vmatpush3.bf16.msra.mxu1 %v2881_v50 }
 0x36b   :  { %2639 = vmatprep.subr.bf16.mxu1 %v2915_v15 }
 0x36e   :  { %2640 = vmatpush3.bf16.msra.mxu1 %v2882_v44 }
 0x36f   :  { %2641 = vmatprep.subr.bf16.mxu1 %v2915_v15 }
 0x372   :  { %2642 = vmatpush3.bf16.msra.mxu1 %v2883_v41 }
 0x373   :  { %2643 = vmatprep.subr.bf16.mxu1 %v2915_v15 }
 0x376   :  { %2644 = vmatpush3.bf16.msra.mxu1 %v2884_v47 }
 0x377   :  { %2669 = vmatprep.subr.bf16.mxu1 %v2915_v15 }
 0x419   :  { %v1837_v49 = vpop.f32.mrf.mxu1 }
 0x41a   :  { %v1838_v58 = vadd.f32 %v2330_v48, %v1837_v49 }
 0x41b   :  { %v2627_v53 = vpop.f32.mrf.mxu1 }
 0x41c   :  { %v1843_v60 = vmax.f32 %v1838_v58, 0.0 }
 0x41d   :  { %v1840_v55 = vpop.f32.mrf.mxu1 }
 0x41e   :  { %v1861_v40 = vpack.c.bf16 %v1843_v60, %v1843_v60 }
 0x41f   :  { %v2628_v51 = vpop.f32.mrf.mxu1 }
 0x420   :  { %2646 = vmatmul.mubr.bf16.vlgmr.msra.gmra.mxu1 %v1861_v40 }
 0x421   :  { %2670 = vmatpush3.bf16.msra.mxu1 %v2885_v37  ;;  %2685 = vmatprep.mubr.msk.bf16.mxu1 %vm2916_vm0, %v2915_v15 }
 0x422   :  { %2671 = vmatprep.subr.bf16.mxu1 %v2915_v15 }
 0x425   :  { %2672 = vmatpush3.bf16.msra.mxu1 %v2886_v2 }
 0x426   :  { %2673 = vmatprep.subr.bf16.mxu1 %v2915_v15 }
 0x429   :  { %2674 = vmatpush3.bf16.msra.mxu1 %v2887_v3 }
 0x42a   :  { %2675 = vmatprep.subr.bf16.mxu1 %v2915_v15 }
 0x42d   :  { %2676 = vmatpush3.bf16.msra.mxu1 %v2888_v46 }
 0x42e   :  { %2677 = vmatprep.subr.bf16.mxu1 %v2915_v15 }
 0x431   :  { %2678 = vmatpush3.bf16.msra.mxu1 %v2889_v45 }
 0x432   :  { %2679 = vmatprep.subr.bf16.mxu1 %v2915_v15 }
 0x435   :  { %2680 = vmatpush3.bf16.msra.mxu1 %v2890_v59 }
 0x436   :  { %2681 = vmatprep.subr.bf16.mxu1 %v2915_v15 }
 0x439   :  { %2682 = vmatpush3.bf16.msra.mxu1 %v2891_v28 }
 0x43a   :  { %2683 = vmatprep.subr.bf16.mxu1 %v2915_v15  ;;  %v2356_v15 = vld [vmem:[%s3742_s15] ss:$0 sm:$0xff] }
 0x43d   :  { %2684 = vmatpush3.bf16.msra.mxu1 %v2892_v56 }
 0x4e0   :  { %v1960_v52 = vpop.f32.mrf.mxu1 }
 0x4e1   :  { %v2049_v0 = vadd.f32 %v3620_v11, %v1960_v52 }
 0x4e2   :  { %v2647_v5 = vpop.f32.mrf.mxu1 }
 0x4e3   :  { %v2061_v6 = vadd.f32 %v2355_v10, %v2049_v0 }
 0x4e4   :  { %v1963_v1 = vpop.f32.mrf.mxu1 }
 0x4e5   :  { %v2062_v7 = vmax.f32 %v2061_v6, 0.0 }
 0x4e6   :  { %v2648_v8 = vpop.f32.mrf.mxu1 }
 0x4e7   :  { %v2063_v25 = vpack.c.bf16 %v2062_v7, %v2062_v7 }
 0x4e9   :  { %2686 = vmatmul.mubr.bf16.vlgmr.msra.gmra.mxu1 %v2063_v25 }
 0x5a9   :  { %v2169_v9 = vpop.f32.mrf.mxu1 }
 0x5aa   :  { %v2170_v43 = vadd.f32 %v2356_v15, %v2169_v9 }
 0x5ab   :  { %v2687_v12 = vpop.f32.mrf.mxu1 }
 0x5ac   :  { %2175 = vst [vmem:[#allocation2] sm:$0x3] %v2170_v43 }
 0x5ad   :  { %v2172_v42 = vpop.f32.mrf.mxu1 }
 0x5ae   :  { %2904 = shalt.err (!%p2901_p4)
}
 0x5af   :  { %2185 = dma.vmem_to_hbm [thread:$0]  %s2183_s21, 32, %s3743_s16, [#allocation3]   ;;  %v2688_v61 = vpop.f32.mrf.mxu1 }
 0x5b0   :  { %2913 = dma.done.wait [#allocation3], 32  }
 0x5b1   :  { %2914 = vsyncadd [#allocation3], 4294967264 }
 0x5b2   :  { %2189 = vsyncpa [#allocation3], 1 }

</bundles_post_ra>
